<compile_context>
chip_gen: v7x
topology: tpu7x:2x2x1
jax: 0.10.0
libtpu: 0.0.40
codegen_flags: <defaults>
</compile_context>

<pallas_src>
import jax
import jax.numpy as jnp
from jax import lax
from jax.experimental import pallas as pl
from jax.experimental.pallas import tpu as pltpu


def _round_up(v, m):
    return ((v + m - 1) // m) * m


def _auto_num_splits():
    """2 partial accumulators on dual-TensorCore parts (v7x), else 1."""
    try:
        kind = jax.devices()[0].device_kind.lower()
    except Exception:
        return 1
    return 2 if "v7" in kind else 1


def _gsa_kernel(first_ref, last_ref, pts_ref, w1_ref, b1_ref, w2_ref, b2_ref,
                out_ref):
    """One grid step: MLP on a packed [TN, C+4] point tile + gated segment-max.

    first_ref/last_ref : SMEM int32 [T]  per-tile first/last batch id present
    pts_ref            : [TN, C+4] bf16  (x | pos | batch_id); pad rows are -1
    w1_ref             : [C+4, H1] bf16  first-layer weights (bid row = zeros)
    b1_ref             : [1, H1]   f32
    w2_ref             : [H1, H2]  bf16
    b2_ref             : [1, H2]   f32
    out_ref            : [B, H2]   f32   resident accumulator for this split
    """
    p = pl.program_id(0)
    i = pl.program_id(1)

    @pl.when(i == 0)
    def _():
        out_ref[...] = jnp.full(out_ref.shape, -jnp.inf, out_ref.dtype)

    pts = pts_ref[...]                                          # [TN, C+4] bf16

    # MLP hot path: MXU matmuls in bf16, accumulate + epilogue in f32.
    h = jnp.dot(pts, w1_ref[...], preferred_element_type=jnp.float32)
    h = jnp.maximum(h + b1_ref[...], 0.0)                       # [TN, H1] f32
    f = jnp.dot(h.astype(jnp.bfloat16), w2_ref[...],
                preferred_element_type=jnp.float32)
    f = jnp.maximum(f + b2_ref[...], 0.0)                       # [TN, H2] f32

    nf = pts.shape[1]
    bids = pts[:, nf - 1:nf].astype(jnp.float32)                # [TN, 1]

    # Segment (global) max-pool, gated to the batches present in this tile.
    # Padded rows carry bid = -1 and never match any b >= 0.
    t = p * pl.num_programs(1) + i
    first_b = first_ref[t]
    last_b = last_ref[t]                                        # < first_b if empty

    def body(b, carry):
        masked = jnp.where(bids == b.astype(jnp.float32), f, -jnp.inf)
        seg = jnp.max(masked, axis=0, keepdims=True)            # [1, H2]
        row = out_ref[pl.ds(b, 1), :]
        out_ref[pl.ds(b, 1), :] = jnp.maximum(row, seg)
        return carry

    lax.fori_loop(first_b, last_b + 1, body, 0)


def global_set_abstraction(x, pos, batch, params, *, num_batches,
                           tile_n=4096, num_splits=None):
    """Pallas implementation of GlobalSetAbstraction.forward.

    x:     [N, C] float32 point features
    pos:   [N, 3] float32 coordinates
    batch: [N]    integer batch ids in [0, num_batches), sorted (PyG convention)
    params: dict with w1 [C+3, H1], b1 [H1], w2 [H1, H2], b2 [H2]

    Returns (pooled [B, H2] f32, pos_out [B, 3], batch_out [B] int32).
    """
    n, c = x.shape
    assert pos.shape == (n, 3)
    assert 1 <= num_batches <= 256, "bf16-packed batch ids are exact only for B <= 256"

    w1 = params["w1"]
    assert w1.shape[0] == c + 3
    h1 = w1.shape[1]
    w2 = params["w2"]
    h2 = w2.shape[1]

    if num_splits is None:
        num_splits = _auto_num_splits()

    # Tile sizing: big tiles (few grid steps), multiple of 16 rows so the bf16
    # stream keeps its native (16, 128) sublane packing; shrunk for tiny inputs.
    per_split = pl.cdiv(n, num_splits)
    tn = _round_up(min(tile_n, max(per_split, 1)), 16)
    tiles_per_split = pl.cdiv(per_split, tn)
    n_tiles = num_splits * tiles_per_split
    n_pad = n_tiles * tn
    pad = n_pad - n

    # Single packed bf16 stream: (x | pos | batch_id).  Padded rows are -1
    # everywhere, so their batch id never matches a real graph and their MLP
    # output is masked out in the pooling step.
    packed = jnp.concatenate(
        [x, pos, batch.astype(x.dtype)[:, None]], axis=1).astype(jnp.bfloat16)
    packed = jnp.pad(packed, ((0, pad), (0, 0)), constant_values=-1.0)

    # First-layer weight with a zero row for the batch-id column.
    w1p = jnp.pad(w1, ((0, 1), (0, 0))).astype(jnp.bfloat16)        # [C+4, H1]
    b1 = params["b1"].reshape(1, h1).astype(jnp.float32)
    w2b = w2.astype(jnp.bfloat16)
    b2 = params["b2"].reshape(1, h2).astype(jnp.float32)

    # Per-tile (first, last) batch-id bounds for gating the segment max.
    # Fully-padded tiles get first > last -> zero pooling iterations.
    batch_i32 = batch.astype(jnp.int32)
    first = jnp.pad(batch_i32, (0, pad),
                    constant_values=num_batches).reshape(n_tiles, tn).min(axis=1)
    last = jnp.pad(batch_i32, (0, pad),
                   constant_values=-1).reshape(n_tiles, tn).max(axis=1)
    first = first.astype(jnp.int32)
    last = last.astype(jnp.int32)

    tiles = tiles_per_split  # captured by index maps
    partial = pl.pallas_call(
        _gsa_kernel,
        out_shape=jax.ShapeDtypeStruct((num_splits, num_batches, h2), jnp.float32),
        grid_spec=pltpu.PrefetchScalarGridSpec(
            num_scalar_prefetch=2,
            grid=(num_splits, tiles_per_split),
            in_specs=[
                pl.BlockSpec((tn, c + 4), lambda p, i, *_: (p * tiles + i, 0)),
                pl.BlockSpec((c + 4, h1), lambda p, i, *_: (0, 0)),
                pl.BlockSpec((1, h1), lambda p, i, *_: (0, 0)),
                pl.BlockSpec((h1, h2), lambda p, i, *_: (0, 0)),
                pl.BlockSpec((1, h2), lambda p, i, *_: (0, 0)),
            ],
            out_specs=pl.BlockSpec((None, num_batches, h2),
                                   lambda p, i, *_: (p, 0, 0)),
        ),
        compiler_params=pltpu.CompilerParams(
            dimension_semantics=("parallel", "arbitrary")),
    )(first, last, packed, w1p, b1, w2b, b2)

    pooled = jnp.max(partial, axis=0)                           # [B, H2]
    # Empty segments (batch id with zero points) -> 0, matching torch_geometric's
    # scatter-max-into-zeros convention; no-op for non-empty segments since the
    # trailing ReLU makes every feature >= 0.
    pooled = jnp.maximum(pooled, 0.0)

    pos_out = jnp.zeros((num_batches, 3), dtype=pos.dtype)
    batch_out = jnp.arange(num_batches, dtype=jnp.int32)
    return pooled, pos_out, batch_out


def _reference(x, pos, batch, params, num_batches):
    """Plain-JAX reference using the same bf16-input / f32-accumulate numerics."""
    bf = lambda a: a.astype(jnp.bfloat16)
    xin = jnp.concatenate([x, pos], axis=1)
    h = jnp.dot(bf(xin), bf(params["w1"]), preferred_element_type=jnp.float32)
    h = jnp.maximum(h + params["b1"], 0.0)
    f = jnp.dot(bf(h), bf(params["w2"]), preferred_element_type=jnp.float32)
    f = jnp.maximum(f + params["b2"], 0.0)
    out = jnp.full((num_batches, f.shape[1]), -jnp.inf, jnp.float32)
    out = out.at[batch].max(f)
    return jnp.maximum(out, 0.0)


if __name__ == "__main__":
    key = jax.random.PRNGKey(0)
    k_x, k_pos, k_w1, k_b1, k_w2, k_b2 = jax.random.split(key, 6)

    # Small shapes: N=16 points, C=4 feature channels, B=2 graphs, MLP 7->32->64.
    N, C, B = 16, 4, 2
    H1, H2 = 32, 64
    FIN = C + 3

    x = jax.random.normal(k_x, (N, C), dtype=jnp.float32)
    pos = jax.random.normal(k_pos, (N, 3), dtype=jnp.float32)
    batch = jnp.repeat(jnp.arange(B, dtype=jnp.int32), N // B)   # [0]*8 + [1]*8

    # Deterministic synthetic MLP parameters (nn.Sequential of 2x (Linear+ReLU)).
    params = {
        "w1": jax.random.normal(k_w1, (FIN, H1), dtype=jnp.float32) * 0.1,
        "b1": jax.random.normal(k_b1, (H1,), dtype=jnp.float32) * 0.1,
        "w2": jax.random.normal(k_w2, (H1, H2), dtype=jnp.float32) * 0.1,
        "b2": jax.random.normal(k_b2, (H2,), dtype=jnp.float32) * 0.1,
    }

    pooled, pos_out, batch_out = global_set_abstraction(
        x, pos, batch, params, num_batches=B)
    jax.block_until_ready((pooled, pos_out, batch_out))

    ref = _reference(x, pos, batch, params, B)
    assert pooled.shape == (B, H2)
    assert pos_out.shape == (B, 3) and jnp.all(pos_out == 0)
    assert jnp.array_equal(batch_out, jnp.arange(B, dtype=jnp.int32))
    assert jnp.allclose(pooled, ref, atol=2e-2, rtol=2e-2), "mismatch vs reference"

    print("KERNEL_OK")
</pallas_src>

<mosaic_0001>
module attributes {stable_mosaic.version = 11 : i64} {
  func.func @_gsa_kernel(%arg0: i32, %arg1: i32, %arg2: memref<1xi32, #tpu.memory_space<smem>>, %arg3: memref<1xi32, #tpu.memory_space<smem>>, %arg4: memref<16x8xbf16, #tpu.memory_space<vmem>>, %arg5: memref<8x32xbf16, #tpu.memory_space<vmem>>, %arg6: memref<1x32xf32, #tpu.memory_space<vmem>>, %arg7: memref<32x64xbf16, #tpu.memory_space<vmem>>, %arg8: memref<1x64xf32, #tpu.memory_space<vmem>>, %arg9: memref<1x2x64xf32, #tpu.memory_space<vmem>>) attributes {dimension_semantics = [#tpu.dimension_semantics<parallel>, #tpu.dimension_semantics<arbitrary>], iteration_bounds = array<i64: 1, 1>, scalar_prefetch = 2 : i64, scratch_operands = 0 : i64, tpu.core_type = #tpu.core_type<tc>, window_params = [{transform_indices = @transform_0, window_bounds = array<i64: 16, 8>}, {pipeline_mode = #tpu.pipeline_mode<synchronous>, transform_indices = @transform_1, window_bounds = array<i64: 8, 32>}, {pipeline_mode = #tpu.pipeline_mode<synchronous>, transform_indices = @transform_2, window_bounds = array<i64: 1, 32>}, {pipeline_mode = #tpu.pipeline_mode<synchronous>, transform_indices = @transform_3, window_bounds = array<i64: 32, 64>}, {pipeline_mode = #tpu.pipeline_mode<synchronous>, transform_indices = @transform_4, window_bounds = array<i64: 1, 64>}, {transform_indices = @transform_5, window_bounds = array<i64: 1, 2, 64>}]} {
    %c0_i32 = arith.constant 0 : i32
    %0 = arith.cmpi eq, %arg1, %c0_i32 : i32
    %1 = arith.extui %0 : i1 to i32
    %c0_i32_0 = arith.constant 0 : i32
    %2 = arith.cmpi ne, %1, %c0_i32_0 : i32
    scf.if %2 {
      %cst_16 = arith.constant 0xFF800000 : f32
      %30 = vector.broadcast %cst_16 : f32 to vector<2x64xf32>
      %c0_17 = arith.constant 0 : index
      %c0_18 = arith.constant 0 : index
      %c0_19 = arith.constant 0 : index
      %31 = vector.load %arg9[%c0_17, %c0_18, %c0_19] : memref<1x2x64xf32, #tpu.memory_space<vmem>>, vector<1x2x64xf32>
      %32 = vector.shape_cast %31 : vector<1x2x64xf32> to vector<2x64xf32>
      %33 = vector.shape_cast %30 : vector<2x64xf32> to vector<1x2x64xf32>
      tpu.vector_store %arg9[%c0_17, %c0_18, %c0_19], %33 {strides = array<i32>} : memref<1x2x64xf32, #tpu.memory_space<vmem>>, vector<1x2x64xf32>,
    } else {
    }
    %c0 = arith.constant 0 : index
    %c0_1 = arith.constant 0 : index
    %3 = vector.load %arg4[%c0, %c0_1] : memref<16x8xbf16, #tpu.memory_space<vmem>>, vector<16x8xbf16>
    %c0_2 = arith.constant 0 : index
    %c0_3 = arith.constant 0 : index
    %4 = vector.load %arg5[%c0_2, %c0_3] : memref<8x32xbf16, #tpu.memory_space<vmem>>, vector<8x32xbf16>
    %cst = arith.constant dense<0.000000e+00> : vector<16x32xf32>
    %5 = tpu.matmul %3, %4, %cst {dimension_numbers = #tpu.dot_dimension_numbers<[1], [0], [0], [1], [0, 0, 1, 1], [], []>} : vector<16x8xbf16>, vector<8x32xbf16>, vector<16x32xf32> -> vector<16x32xf32>
    %c0_4 = arith.constant 0 : index
    %c0_5 = arith.constant 0 : index
    %6 = vector.load %arg6[%c0_4, %c0_5] : memref<1x32xf32, #tpu.memory_space<vmem>>, vector<1x32xf32>
    %7 = vector.broadcast %6 : vector<1x32xf32> to vector<16x32xf32>
    %8 = arith.addf %5, %7 : vector<16x32xf32>
    %cst_6 = arith.constant 0.000000e+00 : f32
    %9 = vector.broadcast %cst_6 : f32 to vector<16x32xf32>
    %10 = arith.maximumf %8, %9 : vector<16x32xf32>
    %11 = arith.truncf %10 : vector<16x32xf32> to vector<16x32xbf16>
    %c0_7 = arith.constant 0 : index
    %c0_8 = arith.constant 0 : index
    %12 = vector.load %arg7[%c0_7, %c0_8] : memref<32x64xbf16, #tpu.memory_space<vmem>>, vector<32x64xbf16>
    %cst_9 = arith.constant dense<0.000000e+00> : vector<16x64xf32>
    %13 = tpu.matmul %11, %12, %cst_9 {dimension_numbers = #tpu.dot_dimension_numbers<[1], [0], [0], [1], [0, 0, 1, 1], [], []>} : vector<16x32xbf16>, vector<32x64xbf16>, vector<16x64xf32> -> vector<16x64xf32>
    %c0_10 = arith.constant 0 : index
    %c0_11 = arith.constant 0 : index
    %14 = vector.load %arg8[%c0_10, %c0_11] : memref<1x64xf32, #tpu.memory_space<vmem>>, vector<1x64xf32>
    %15 = vector.broadcast %14 : vector<1x64xf32> to vector<16x64xf32>
    %16 = arith.addf %13, %15 : vector<16x64xf32>
    %cst_12 = arith.constant 0.000000e+00 : f32
    %17 = vector.broadcast %cst_12 : f32 to vector<16x64xf32>
    %18 = arith.maximumf %16, %17 : vector<16x64xf32>
    %19 = vector.extract_strided_slice %3 {offsets = [0, 7], sizes = [16, 1], strides = [1, 1]} : vector<16x8xbf16> to vector<16x1xbf16>
    %20 = arith.extf %19 : vector<16x1xbf16> to vector<16x1xf32>
    %c1_i32 = arith.constant 1 : i32
    %21 = arith.muli %arg0, %c1_i32 : i32
    %22 = arith.addi %21, %arg1 : i32
    %23 = arith.index_cast %22 : i32 to index
    %24 = memref.load %arg2[%23] : memref<1xi32, #tpu.memory_space<smem>>
    %25 = arith.index_cast %22 : i32 to index
    %26 = memref.load %arg3[%25] : memref<1xi32, #tpu.memory_space<smem>>
    %c1_i32_13 = arith.constant 1 : i32
    %27 = arith.addi %26, %c1_i32_13 : i32
    %c0_i32_14 = arith.constant 0 : i32
    %28 = arith.subi %27, %24 : i32
    %29 = arith.addi %24, %28 : i32
    %c1_i32_15 = arith.constant 1 : i32
    scf.for %arg10 = %24 to %29 step %c1_i32_15  : i32 {
      %30 = arith.sitofp %arg10 : i32 to f32
      %31 = vector.broadcast %30 : f32 to vector<16x1xf32>
      %32 = arith.cmpf oeq, %20, %31 : vector<16x1xf32>
      %cst_16 = arith.constant 0xFF800000 : f32
      %33 = vector.shape_cast %32 : vector<16x1xi1> to vector<16x1xi1>
      %34 = vector.broadcast %33 : vector<16x1xi1> to vector<16x64xi1>
      %35 = vector.broadcast %cst_16 : f32 to vector<16x64xf32>
      %36 = arith.select %34, %18, %35 : vector<16x64xi1>, vector<16x64xf32>
      %cst_17 = arith.constant dense<0xFF800000> : vector<64xf32>
      %37 = vector.multi_reduction <maximumf>, %36, %cst_17 [0] : vector<16x64xf32> to vector<64xf32>
      %38 = vector.shape_cast %37 : vector<64xf32> to vector<1x64xf32>
      %c0_18 = arith.constant 0 : index
      %39 = arith.index_cast %arg10 : i32 to index
      %c0_19 = arith.constant 0 : index
      %40 = vector.load %arg9[%c0_18, %39, %c0_19] : memref<1x2x64xf32, #tpu.memory_space<vmem>>, vector<1x1x64xf32>
      %41 = vector.shape_cast %40 : vector<1x1x64xf32> to vector<1x64xf32>
      %42 = arith.maximumf %41, %38 : vector<1x64xf32>
      %c0_20 = arith.constant 0 : index
      %43 = arith.index_cast %arg10 : i32 to index
      %c0_21 = arith.constant 0 : index
      %44 = vector.load %arg9[%c0_20, %43, %c0_21] : memref<1x2x64xf32, #tpu.memory_space<vmem>>, vector<1x1x64xf32>
      %45 = vector.shape_cast %44 : vector<1x1x64xf32> to vector<1x64xf32>
      %46 = vector.shape_cast %42 : vector<1x64xf32> to vector<1x1x64xf32>
      tpu.vector_store %arg9[%c0_20, %43, %c0_21], %46 {strides = array<i32>} : memref<1x2x64xf32, #tpu.memory_space<vmem>>, vector<1x1x64xf32>,
    }
    return
  }
  func.func @transform_0(%arg0: i32, %arg1: i32, %arg2: memref<1xi32, #tpu.memory_space<smem>>, %arg3: memref<1xi32, #tpu.memory_space<smem>>) -> (i32, i32) {
    %c1_i32 = arith.constant 1 : i32
    %0 = arith.muli %arg0, %c1_i32 : i32
    %1 = arith.addi %0, %arg1 : i32
    %c0_i32 = arith.constant 0 : i32
    %c0_i32_0 = arith.constant 0 : i32
    return %1, %c0_i32 : i32, i32
  }
  func.func @transform_1(%arg0: i32, %arg1: i32, %arg2: memref<1xi32, #tpu.memory_space<smem>>, %arg3: memref<1xi32, #tpu.memory_space<smem>>) -> (i32, i32) {
    %c0_i32 = arith.constant 0 : i32
    %c0_i32_0 = arith.constant 0 : i32
    %c0_i32_1 = arith.constant 0 : i32
    return %c0_i32, %c0_i32_0 : i32, i32
  }
  func.func @transform_2(%arg0: i32, %arg1: i32, %arg2: memref<1xi32, #tpu.memory_space<smem>>, %arg3: memref<1xi32, #tpu.memory_space<smem>>) -> (i32, i32) {
    %c0_i32 = arith.constant 0 : i32
    %c0_i32_0 = arith.constant 0 : i32
    %c0_i32_1 = arith.constant 0 : i32
    return %c0_i32, %c0_i32_0 : i32, i32
  }
  func.func @transform_3(%arg0: i32, %arg1: i32, %arg2: memref<1xi32, #tpu.memory_space<smem>>, %arg3: memref<1xi32, #tpu.memory_space<smem>>) -> (i32, i32) {
    %c0_i32 = arith.constant 0 : i32
    %c0_i32_0 = arith.constant 0 : i32
    %c0_i32_1 = arith.constant 0 : i32
    return %c0_i32, %c0_i32_0 : i32, i32
  }
  func.func @transform_4(%arg0: i32, %arg1: i32, %arg2: memref<1xi32, #tpu.memory_space<smem>>, %arg3: memref<1xi32, #tpu.memory_space<smem>>) -> (i32, i32) {
    %c0_i32 = arith.constant 0 : i32
    %c0_i32_0 = arith.constant 0 : i32
    %c0_i32_1 = arith.constant 0 : i32
    return %c0_i32, %c0_i32_0 : i32, i32
  }
  func.func @transform_5(%arg0: i32, %arg1: i32, %arg2: memref<1xi32, #tpu.memory_space<smem>>, %arg3: memref<1xi32, #tpu.memory_space<smem>>) -> (i32, i32, i32) {
    %c0_i32 = arith.constant 0 : i32
    %c0_i32_0 = arith.constant 0 : i32
    %c0_i32_1 = arith.constant 0 : i32
    return %arg0, %c0_i32, %c0_i32_0 : i32, i32, i32
  }
}

</mosaic_0001>

<bundles_post_ra>
// kernel: tpu_custom_call.1
= control target key start
LH: loop header
LB: loop body
LE: loop exit
PB: predicated region body
PF: predicated region fallthrough
CT: control target
= control target key end

     0   :  { %14 = vsyncpa [#allocation6], 0  ;;  %vm52_vm0 = vcmask 517120   ;;  %vm73_vm1 = vcmask 1043456   ;;  %v337_v0 = vmov -inf   ;;  %v338_v1 = vmov 0.0   ;;  %s449_s0 = inlined_call_operand.<no memory space> [shape: s32[1], index: 0, kind: input, shape index: {}]   ;;  %s450_s1 = inlined_call_operand.<no memory space> [shape: s32[1], index: 1, kind: input, shape index: {}]   ;;  %s451_s2 = inlined_call_operand.vmem [shape: bf16[16,8], index: 2, kind: input, shape index: {}]   ;;  %s452_s3 = inlined_call_operand.vmem [shape: bf16[8,32], index: 3, kind: input, shape index: {}]   ;;  %s453_s4 = inlined_call_operand.vmem [shape: f32[1,32], index: 4, kind: input, shape index: {}]   ;;  %s454_s5 = inlined_call_operand.vmem [shape: bf16[32,64], index: 5, kind: input, shape index: {}]   ;;  %s455_s6 = inlined_call_operand.vmem [shape: f32[1,64], index: 6, kind: input, shape index: {}]   ;;  %s456_s7 = inlined_call_operand.hbm [shape: f32[1,2,64], index: 7, kind: output, shape index: {}]  }
   0x1   :  { %53 = vst.msk [vmem:[#allocation5] sm:$0x3] %vm52_vm0, %v337_v0  ;;  %272 = vmatprep.subr.bf16.mxu0 %v338_v1  ;;  %v56_v2 = vld [vmem:[%s452_s3] sm:$0xf]  ;;  %vm69_vm2 = vcmask 64512   ;;  %278 = vmatprep.subr.bf16.mxu1 %v338_v1  ;;  %vm339_vm3 = vmmov 0  }
   0x2   :  { %v389_v3 = vld [vmem:[%s451_s2] sm:$0xff]   ;;  %v75_v4 = vsel %vm73_vm1, %v56_v2, 0  ;;  %274 = vmatprep.mubr.msk.bf16.mxu0 %vm339_vm3, %v338_v1  ;;  %282 = vmatprep.mubr.msk.bf16.mxu1 %vm339_vm3, %v338_v1  ;;  %v302_v8 = vld [vmem:[%s454_s5 + $0x8] sm:$0xff]   ;;  %vm144_vm4 = vcmask 261120  }
   0x3   :  { %v191_v5 = vunpack.c.l.bf16 %v389_v3  ;;  %v192_v6 = vunpack.c.h.bf16 %v389_v3  ;;  %273 = vmatpush3.bf16.msra.mxu0 %v75_v4  ;;  %v301_v7 = vld [vmem:[%s454_s5] sm:$0xff]   ;;  %s196_s5 = sadd.s32 1, %s450_s1 }
   0x4   :  { %279 = vmatpush3.bf16.msra.mxu1 %v301_v7  ;;  %v260_v9 = vld [vmem:[%s453_s4] ss:$0 sm:$0xff]  ;;  %p256_p0 = scmp.ge.s32.totalorder %s449_s0, %s196_s5 }
   0x5   :  { %280 = vmatprep.subr.bf16.mxu1 %v338_v1  ;;  %v263_v19 = vld [vmem:[%s455_s6] ss:$0 sm:$0xff] }
   0x6   :  { %275 = vmatmul.mubr.msk.bf16.vlgmr.msra.gmra.mrb[0].mxu0 %vm69_vm2, %v389_v3 }
   0x8   :  { %281 = vmatpush3.bf16.msra.mxu1 %v302_v8 }
  0xd9   :  { %v111_v10 = vpop.f32.mrb[0].mxu0 }
  0xda   :  { %v112_v11 = vadd.f32 %v260_v9, %v111_v10  ;;  %v276_v12 = vpop.f32.mrb[1].mxu0 }
  0xdb   :  { %v114_v13 = vpop.f32.mrb[2].mxu0 }
  0xdc   :  { %v115_v14 = vadd.f32 %v260_v9, %v114_v13  ;;  %v277_v15 = vpop.f32.mrb[3].mxu0  ;;  %v118_v16 = vmax.f32 %v112_v11, 0.0 }
  0xde   :  { %v119_v17 = vmax.f32 %v115_v14, 0.0 }
  0xe0   :  { %v120_v18 = vpack.c.bf16 %v119_v17, %v118_v16 }
  0xe2   :  { %283 = vmatmul.mubr.msk.bf16.vlgmr.msra.gmra.mrb[0].mxu1 %vm144_vm4, %v120_v18 }
 0x1b4   :  { %257 = sbr.rel (%p256_p0) target bundleno = 600 (0x258), region = 49 }
 0x1b5   :  { %v182_v20 = vpop.f32.mrb[0].mxu1 }
 0x1b6   :  { %v183_v21 = vadd.f32 %v263_v19, %v182_v20  ;;  %v284_v22 = vpop.f32.mrb[1].mxu1 }
 0x1b7   :  { %v185_v23 = vpop.f32.mrb[2].mxu1 }
 0x1b8   :  { %v189_v24 = vmax.f32 %v183_v21, 0.0  ;;  %v186_v25 = vadd.f32 %v263_v19, %v185_v23  ;;  %v285_v26 = vpop.f32.mrb[3].mxu1 }
 0x1ba   :  { %v190_v27 = vmax.f32 %v186_v25, 0.0 }
 0x1bb LB: > { %v340_v28 = vmov 7   ;;  %s203_s6 = scvt.s32.f32 %s335_s0  ;;  %v341_v30 = vmov 0   ;;  %vm219_vm8 = vcmask 523264   ;;  %s229_s18 = scalar_lea.vmem [#allocation5], %s335_s0  ;;  %vm232_vm10 = vcmask 516096   ;;  %s335_s0 = sphi %s449_s0, %s200_s0  }
 0x1bc   : > { %304 = vset.pattern.permute.xlu0 %v340_v28  ;;  %v230_v45 = vld [vmem:[%s229_s18] sm:$0x1]  ;;  %s200_s0 = sadd.s32 1, %s335_s0  }
 0x1bd   : > { %v204_v29 = vstv %s203_s6  ;;  %p199_p1 = scmp.ge.s32.totalorder %s200_s0, %s196_s5 }
 0x1be   : > { %vm205_vm5 = vcmp.eq.f32.partialorder %v191_v5, %v204_v29  ;;  %vm206_vm6 = vcmp.eq.f32.partialorder %v192_v6, %v204_v29 }
 0x1bf   : > { %v207_v31 = vsel %vm205_vm5, 1, %v341_v30  ;;  %v208_v32 = vsel %vm206_vm6, 1, %v341_v30 }
 0x1c0   : > { %210 = vperm.xlu0 %304, %v207_v31  }
 0x1c4   : > { %213 = vperm.xlu0 %304, %v208_v32  }
 0x23f   : > { %v211_v33 = vpop.permute.xlu0 %210 }
 0x240   : > { %vm215_vm7 = vcmp.eq.s32.totalorder %v211_v33, 1 }
 0x241   : > { %v217_v34 = vsel %vm215_vm7, %v189_v24, -inf }
 0x242   : > { %v220_v37 = vsel %vm219_vm8, %v217_v34, -inf }
 0x243   : > { %v214_v35 = vpop.permute.xlu0 %213 }
 0x244   : > { %vm216_vm9 = vcmp.eq.s32.totalorder %v214_v35, 1 }
 0x245   : > { %v218_v36 = vsel %vm216_vm9, %v190_v27, -inf }
 0x246   : > { %v221_v38 = vsel %vm219_vm8, %v218_v36, -inf }
 0x247   : > { %v222_v39 = vmax.f32 %v220_v37, %v221_v38 }
 0x249   : > { %v223_v40 = vrot.slane %v222_v39, 4 }
 0x24b   : > { %v224_v41 = vmax.f32 %v222_v39, %v223_v40 }
 0x24d   : > { %v225_v42 = vrot.slane %v224_v41, 2 }
 0x24f   : > { %v226_v43 = vmax.f32 %v224_v41, %v225_v42 }
 0x251   : > { %v227_v44 = vrot.slane %v226_v43, 1  ;;  %202 = sbr.rel (!%p199_p1) target bundleno = 443 (0x1bb), region = 55 }
 0x253   : > { %v228_v46 = vmax.f32 %v226_v43, %v227_v44 }
 0x255   : > { %v231_v47 = vmax.f32 %v230_v45, %v228_v46 }
 0x257   : > { %233 = vst.msk [vmem:[%s229_s18] sm:$0x1] %vm232_vm10, %v231_v47 }
 0x258 PF:  { %s342_s21 = smov [#allocation5]  }
 0x259   :  { %s240_s22 = sshll.u32 %s342_s21, 4  ;;  %s241_s22 = int_to_ptr.vmem [resolvable:$true] %s240_s22 }
 0x25a   :  { %s305_s23 = scalar_lea.vmem %s241_s22, 32  ;;  %p310_p3 = scmp.lt.s32.totalorder %s241_s22, %s241_s22 }
 0x25b   :  { %p306_p2 = scmp.ne.s32.totalorder %s241_s22, %s305_s23  ;;  %p311_p4 = scmp.lt.s32.totalorder %s305_s23, %s305_s23 }
 0x25d   :  { %p312_p5 = por %p311_p4, %p310_p3 }
 0x25f   :  { %p313_p6 = pnand %p312_p5, %p306_p2 }
 0x261   :  { %316 = shalt.err (!%p313_p6)
}
 0x262   :  { %s317_s26 = scalar_lea.hbm %s456_s7, 32 }
 0x263   :  { %p318_p7 = scmp.ne.s32.totalorder %s456_s7, %s317_s26  ;;  %p321_p8 = scmp.lt.u32.totalorder %s317_s26, %s456_s7 }
 0x265   :  { %p323_p9 = pnand %p321_p8, %p318_p7 }
 0x267   :  { %326 = shalt.err (!%p323_p9)
}
 0x268   :  { %243 = dma.vmem_to_hbm [thread:$0]  %s241_s22, 32, %s456_s7, [#allocation6]  }
 0x269   :  { %331 = dma.done.wait [#allocation6], 32  }
 0x26a   :  { %332 = vsyncadd [#allocation6], 4294967264 }
 0x26b   :  { %247 = vsyncpa [#allocation6], 1 }

</bundles_post_ra>
